<compile_context>
chip_gen: v7x
topology: tpu7x:2x2x1
jax: 0.10.0
libtpu: 0.0.40
codegen_flags: <defaults>
</compile_context>

<pallas_src>
import functools

import jax
import jax.numpy as jnp
from jax.experimental import pallas as pl
from jax.experimental.pallas import tpu as pltpu

LANE = 128  # lane-pad target for all feature dimensions


def _round_up(x, m):
    return ((x + m - 1) // m) * m


def _vmem_limit_bytes():
    """Per-generation VMEM budget (≈3/4 of physical, capped at 96 MiB)."""
    try:
        cap = pltpu.get_tpu_info().vmem_capacity_bytes
    except Exception:
        return 48 * 1024 * 1024
    return max(32 * 1024 * 1024, min(int(cap * 3 // 4), 96 * 1024 * 1024))


def _choose_tile(np_):
    if np_ <= 1024:
        return 128
    if np_ <= 4096:
        return 256
    return 512


# --------------------------------------------------------------------------
# Fused path (small/medium N): both layers in one pallas_call, Â resident.
# --------------------------------------------------------------------------
def fused_gcn_kernel(adj_ref, xw1_ref, w2_ref, b1_ref, b2_ref, out_ref):
    """out = Â @ (relu(Â @ Xw1 + b1) @ W2) + b2  — everything VMEM-resident."""
    adj = adj_ref[...]                                             # (Np, Np) bf16
    h = jnp.dot(adj, xw1_ref[...], preferred_element_type=jnp.float32) + b1_ref[...]
    h = jnp.maximum(h, 0.0)
    # TODO(synk): dropout(p=0.5, training=True) omitted — eval identity.
    hw2 = jnp.dot(h.astype(jnp.bfloat16), w2_ref[...],
                  preferred_element_type=jnp.float32)              # (Np, LANE)
    out = jnp.dot(adj, hw2.astype(jnp.bfloat16),
                  preferred_element_type=jnp.float32) + b2_ref[...]
    out_ref[...] = out.astype(out_ref.dtype)


def _fused_gcn(adj_bf16, xw1_pad, w2_bf16, b1_pad, b2_pad):
    np_ = adj_bf16.shape[0]
    # NOTE: single grid step — on v7x one TensorCore idles, acceptable at the
    # small sizes this path is gated to (DMA/overhead dominated).
    return pl.pallas_call(
        fused_gcn_kernel,
        out_shape=jax.ShapeDtypeStruct((np_, LANE), jnp.float32),
        grid_spec=pltpu.PrefetchScalarGridSpec(
            num_scalar_prefetch=0,
            grid=(1,),
            in_specs=[
                pl.BlockSpec((np_, np_), lambda i: (0, 0)),    # Â (resident)
                pl.BlockSpec((np_, LANE), lambda i: (0, 0)),   # X @ W1 (resident)
                pl.BlockSpec((LANE, LANE), lambda i: (0, 0)),  # W2 (resident)
                pl.BlockSpec((1, LANE), lambda i: (0, 0)),     # b1
                pl.BlockSpec((1, LANE), lambda i: (0, 0)),     # b2
            ],
            out_specs=pl.BlockSpec((np_, LANE), lambda i: (0, 0)),
        ),
        compiler_params=pltpu.CompilerParams(
            dimension_semantics=("arbitrary",),
            vmem_limit_bytes=_vmem_limit_bytes(),
        ),
    )(adj_bf16, xw1_pad, w2_bf16, b1_pad, b2_pad)


# --------------------------------------------------------------------------
# Tiled path (large N): one pallas_call per layer, Â streamed, Xw resident.
# --------------------------------------------------------------------------
def propagate_kernel(adj_ref, xw_ref, b_ref, out_ref, acc_ref, *, apply_relu, tk):
    """acc += Â[i,k] @ Xw[k]; epilogue: out = [relu](acc + b).

    adj_ref : (T, T)      bf16  streamed Â tile
    xw_ref  : (Np, LANE)  bf16  full pre-transformed features (VMEM resident)
    b_ref   : (1, LANE)   f32   bias
    out_ref : (T, LANE)         layer output row tile
    acc_ref : (T, LANE)   f32   VMEM accumulator scratch
    """
    k = pl.program_id(1)

    @pl.when(k == 0)
    def _init():
        acc_ref[...] = jnp.zeros_like(acc_ref)

    off = pl.multiple_of(k * tk, tk)
    acc_ref[...] += jnp.dot(
        adj_ref[...], xw_ref[pl.ds(off, tk), :], preferred_element_type=jnp.float32
    )

    @pl.when(k == pl.num_programs(1) - 1)
    def _finalize():
        r = acc_ref[...] + b_ref[...]
        if apply_relu:
            r = jnp.maximum(r, 0.0)
        out_ref[...] = r.astype(out_ref.dtype)


def _propagate(adj_bf16, xw_pad, b_pad, *, apply_relu, out_dtype, tile):
    np_ = adj_bf16.shape[0]
    grid = (np_ // tile, np_ // tile)
    return pl.pallas_call(
        functools.partial(propagate_kernel, apply_relu=apply_relu, tk=tile),
        out_shape=jax.ShapeDtypeStruct((np_, LANE), out_dtype),
        grid_spec=pltpu.PrefetchScalarGridSpec(
            num_scalar_prefetch=0,
            grid=grid,
            in_specs=[
                pl.BlockSpec((tile, tile), lambda i, k: (i, k)),  # Â tile (streamed)
                pl.BlockSpec((np_, LANE), lambda i, k: (0, 0)),   # Xw (resident, 1 DMA)
                pl.BlockSpec((1, LANE), lambda i, k: (0, 0)),     # bias (resident)
            ],
            out_specs=pl.BlockSpec((tile, LANE), lambda i, k: (i, 0)),
            scratch_shapes=[pltpu.VMEM((tile, LANE), jnp.float32)],
        ),
        compiler_params=pltpu.CompilerParams(
            dimension_semantics=("parallel", "arbitrary"),
            vmem_limit_bytes=_vmem_limit_bytes(),
        ),
    )(adj_bf16, xw_pad, b_pad)


# --------------------------------------------------------------------------
# Wrapper: conv1 -> relu -> dropout(identity, eval) -> conv2
# --------------------------------------------------------------------------
def gcn_forward(adj_norm, x, w1, b1, w2, b2, *, force_tiled=False):
    n = x.shape[0]
    out_f = w2.shape[1]

    np_ = _round_up(n, LANE)
    use_fused = (not force_tiled) and np_ <= 2048
    tile = None
    if not use_fused:
        tile = _choose_tile(np_)
        np_ = _round_up(np_, tile)

    # Fold the feature transform into the features before propagation:
    # Â @ (X @ W) == (Â @ X) @ W, and X@W is tiny vs the N² propagation.
    xw1 = jnp.dot(x.astype(jnp.float32), w1.astype(jnp.float32))        # (n, hid)
    xw1_pad = (
        jnp.zeros((np_, LANE), jnp.float32)
        .at[:n, : xw1.shape[1]].set(xw1)
        .astype(jnp.bfloat16)
    )
    adj_pad = (
        jnp.zeros((np_, np_), jnp.float32)
        .at[:n, :n].set(adj_norm.astype(jnp.float32))
        .astype(jnp.bfloat16)
    )
    b1_pad = jnp.zeros((1, LANE), jnp.float32).at[:, : b1.shape[-1]].set(
        b1.reshape(1, -1).astype(jnp.float32))
    b2_pad = jnp.zeros((1, LANE), jnp.float32).at[:, : b2.shape[-1]].set(
        b2.reshape(1, -1).astype(jnp.float32))
    w2_pad = jnp.zeros((LANE, LANE), jnp.float32).at[: w2.shape[0], : w2.shape[1]].set(
        w2.astype(jnp.float32))

    if use_fused:
        out_pad = _fused_gcn(adj_pad, xw1_pad, w2_pad.astype(jnp.bfloat16),
                             b1_pad, b2_pad)
    else:
        # Layer 1: h = relu(Â @ Xw1 + b1)
        h = _propagate(adj_pad, xw1_pad, b1_pad,
                       apply_relu=True, out_dtype=jnp.bfloat16, tile=tile)
        # TODO(synk): dropout(p=0.5) skipped — inference identity semantics.
        # Fold layer-2 transform in the wrapper (small vs N² propagation).
        hw2 = jnp.dot(h.astype(jnp.float32), w2_pad).astype(jnp.bfloat16)
        # Layer 2: out = Â @ hw2 + b2
        out_pad = _propagate(adj_pad, hw2, b2_pad,
                             apply_relu=False, out_dtype=jnp.float32, tile=tile)

    return out_pad[:n, :out_f]


def build_normalized_adjacency(edge_index, num_nodes):
    """Dense Â = D^-1/2 (A + I) D^-1/2 (GCNConv normalize=True, add_self_loops=True).

    Assumes edge_index has no pre-existing self loops (true for the test graph).
    """
    src, dst = edge_index[0], edge_index[1]
    adj = jnp.zeros((num_nodes, num_nodes), jnp.float32)
    adj = adj.at[dst, src].add(1.0)                       # A[target, source] += 1
    adj = adj + jnp.eye(num_nodes, dtype=jnp.float32)     # self loops
    deg = adj.sum(axis=1)
    d_inv_sqrt = jnp.where(deg > 0, jax.lax.rsqrt(deg), 0.0)
    return d_inv_sqrt[:, None] * adj * d_inv_sqrt[None, :]


def gcn_reference(adj, x, w1, b1, w2, b2):
    h = jnp.maximum(adj @ (x @ w1) + b1, 0.0)
    return adj @ (h @ w2) + b2


if __name__ == "__main__":
    key = jax.random.PRNGKey(0)
    N = 256          # number of graph nodes
    IN_F = 8         # GCNConv(8, hidden_channels)
    HID = 32         # hidden_channels
    OUT_F = 16       # GCNConv(hidden_channels, 16)
    E = 1024         # number of directed edges

    k_x, k_src, k_off, k_w1, k_w2, k_b1, k_b2 = jax.random.split(key, 7)

    # Node features and a random (self-loop-free) edge_index.
    x = jax.random.normal(k_x, (N, IN_F), dtype=jnp.float32)
    src = jax.random.randint(k_src, (E,), 0, N)
    dst = (src + jax.random.randint(k_off, (E,), 1, N)) % N
    edge_index = jnp.stack([src, dst]).astype(jnp.int32)  # [2, E]

    # Deterministic parameters (glorot-ish weights, small random biases so the
    # bias path is actually exercised).
    w1 = jax.random.normal(k_w1, (IN_F, HID), dtype=jnp.float32) * jnp.sqrt(2.0 / (IN_F + HID))
    b1 = jax.random.normal(k_b1, (1, HID), dtype=jnp.float32) * 0.1
    w2 = jax.random.normal(k_w2, (HID, OUT_F), dtype=jnp.float32) * jnp.sqrt(2.0 / (HID + OUT_F))
    b2 = jax.random.normal(k_b2, (1, OUT_F), dtype=jnp.float32) * 0.1

    # Glue: dense normalized adjacency from edge_index.
    adj_norm = build_normalized_adjacency(edge_index, N)

    out_fused = gcn_forward(adj_norm, x, w1, b1, w2, b2)                    # fused path
    out_tiled = gcn_forward(adj_norm, x, w1, b1, w2, b2, force_tiled=True)  # tiled path
    jax.block_until_ready((out_fused, out_tiled))

    ref = gcn_reference(adj_norm, x, w1, b1, w2, b2)
    for name, out in (("fused", out_fused), ("tiled", out_tiled)):
        assert out.shape == (N, OUT_F) and out.dtype == jnp.float32, name
        assert jnp.isfinite(out).all(), name
        max_err = float(jnp.max(jnp.abs(out - ref)))
        assert max_err < 0.1, f"{name}: max abs error vs f32 reference too large: {max_err}"
    print("KERNEL_OK")
</pallas_src>

<mosaic_0001>
module attributes {stable_mosaic.version = 11 : i64} {
  func.func @fused_gcn_kernel(%arg0: i32, %arg1: memref<256x256xbf16, #tpu.memory_space<vmem>>, %arg2: memref<256x128xbf16, #tpu.memory_space<vmem>>, %arg3: memref<128x128xbf16, #tpu.memory_space<vmem>>, %arg4: memref<1x128xf32, #tpu.memory_space<vmem>>, %arg5: memref<1x128xf32, #tpu.memory_space<vmem>>, %arg6: memref<256x128xf32, #tpu.memory_space<vmem>>) attributes {dimension_semantics = [#tpu.dimension_semantics<arbitrary>], iteration_bounds = array<i64: 1>, scalar_prefetch = 0 : i64, scratch_operands = 0 : i64, tpu.core_type = #tpu.core_type<tc>, window_params = [{pipeline_mode = #tpu.pipeline_mode<synchronous>, transform_indices = @transform_0, window_bounds = array<i64: 256, 256>}, {pipeline_mode = #tpu.pipeline_mode<synchronous>, transform_indices = @transform_1, window_bounds = array<i64: 256, 128>}, {pipeline_mode = #tpu.pipeline_mode<synchronous>, transform_indices = @transform_2, window_bounds = array<i64: 128, 128>}, {pipeline_mode = #tpu.pipeline_mode<synchronous>, transform_indices = @transform_3, window_bounds = array<i64: 1, 128>}, {pipeline_mode = #tpu.pipeline_mode<synchronous>, transform_indices = @transform_4, window_bounds = array<i64: 1, 128>}, {pipeline_mode = #tpu.pipeline_mode<synchronous>, transform_indices = @transform_5, window_bounds = array<i64: 256, 128>}]} {
    %c0 = arith.constant 0 : index
    %c0_0 = arith.constant 0 : index
    %0 = vector.load %arg1[%c0, %c0_0] : memref<256x256xbf16, #tpu.memory_space<vmem>>, vector<256x256xbf16>
    %c0_1 = arith.constant 0 : index
    %c0_2 = arith.constant 0 : index
    %1 = vector.load %arg2[%c0_1, %c0_2] : memref<256x128xbf16, #tpu.memory_space<vmem>>, vector<256x128xbf16>
    %cst = arith.constant dense<0.000000e+00> : vector<256x128xf32>
    %2 = tpu.matmul %0, %1, %cst {dimension_numbers = #tpu.dot_dimension_numbers<[1], [0], [0], [1], [0, 0, 1, 1], [], []>} : vector<256x256xbf16>, vector<256x128xbf16>, vector<256x128xf32> -> vector<256x128xf32>
    %c0_3 = arith.constant 0 : index
    %c0_4 = arith.constant 0 : index
    %3 = vector.load %arg4[%c0_3, %c0_4] : memref<1x128xf32, #tpu.memory_space<vmem>>, vector<1x128xf32>
    %4 = vector.broadcast %3 : vector<1x128xf32> to vector<256x128xf32>
    %5 = arith.addf %2, %4 : vector<256x128xf32>
    %cst_5 = arith.constant 0.000000e+00 : f32
    %6 = vector.broadcast %cst_5 : f32 to vector<256x128xf32>
    %7 = arith.maximumf %5, %6 : vector<256x128xf32>
    %8 = arith.truncf %7 : vector<256x128xf32> to vector<256x128xbf16>
    %c0_6 = arith.constant 0 : index
    %c0_7 = arith.constant 0 : index
    %9 = vector.load %arg3[%c0_6, %c0_7] : memref<128x128xbf16, #tpu.memory_space<vmem>>, vector<128x128xbf16>
    %cst_8 = arith.constant dense<0.000000e+00> : vector<256x128xf32>
    %10 = tpu.matmul %8, %9, %cst_8 {dimension_numbers = #tpu.dot_dimension_numbers<[1], [0], [0], [1], [0, 0, 1, 1], [], []>} : vector<256x128xbf16>, vector<128x128xbf16>, vector<256x128xf32> -> vector<256x128xf32>
    %11 = arith.truncf %10 : vector<256x128xf32> to vector<256x128xbf16>
    %cst_9 = arith.constant dense<0.000000e+00> : vector<256x128xf32>
    %12 = tpu.matmul %0, %11, %cst_9 {dimension_numbers = #tpu.dot_dimension_numbers<[1], [0], [0], [1], [0, 0, 1, 1], [], []>} : vector<256x256xbf16>, vector<256x128xbf16>, vector<256x128xf32> -> vector<256x128xf32>
    %c0_10 = arith.constant 0 : index
    %c0_11 = arith.constant 0 : index
    %13 = vector.load %arg5[%c0_10, %c0_11] : memref<1x128xf32, #tpu.memory_space<vmem>>, vector<1x128xf32>
    %14 = vector.broadcast %13 : vector<1x128xf32> to vector<256x128xf32>
    %15 = arith.addf %12, %14 : vector<256x128xf32>
    %c0_12 = arith.constant 0 : index
    %c0_13 = arith.constant 0 : index
    %16 = vector.load %arg6[%c0_12, %c0_13] : memref<256x128xf32, #tpu.memory_space<vmem>>, vector<256x128xf32>
    tpu.vector_store %arg6[%c0_12, %c0_13], %15 {strides = array<i32>} : memref<256x128xf32, #tpu.memory_space<vmem>>, vector<256x128xf32>,
    return
  }
  func.func @transform_0(%arg0: i32) -> (i32, i32) {
    %c0_i32 = arith.constant 0 : i32
    %c0_i32_0 = arith.constant 0 : i32
    %c0_i32_1 = arith.constant 0 : i32
    return %c0_i32, %c0_i32_0 : i32, i32
  }
  func.func @transform_1(%arg0: i32) -> (i32, i32) {
    %c0_i32 = arith.constant 0 : i32
    %c0_i32_0 = arith.constant 0 : i32
    %c0_i32_1 = arith.constant 0 : i32
    return %c0_i32, %c0_i32_0 : i32, i32
  }
  func.func @transform_2(%arg0: i32) -> (i32, i32) {
    %c0_i32 = arith.constant 0 : i32
    %c0_i32_0 = arith.constant 0 : i32
    %c0_i32_1 = arith.constant 0 : i32
    return %c0_i32, %c0_i32_0 : i32, i32
  }
  func.func @transform_3(%arg0: i32) -> (i32, i32) {
    %c0_i32 = arith.constant 0 : i32
    %c0_i32_0 = arith.constant 0 : i32
    %c0_i32_1 = arith.constant 0 : i32
    return %c0_i32, %c0_i32_0 : i32, i32
  }
  func.func @transform_4(%arg0: i32) -> (i32, i32) {
    %c0_i32 = arith.constant 0 : i32
    %c0_i32_0 = arith.constant 0 : i32
    %c0_i32_1 = arith.constant 0 : i32
    return %c0_i32, %c0_i32_0 : i32, i32
  }
  func.func @transform_5(%arg0: i32) -> (i32, i32) {
    %c0_i32 = arith.constant 0 : i32
    %c0_i32_0 = arith.constant 0 : i32
    %c0_i32_1 = arith.constant 0 : i32
    return %c0_i32, %c0_i32_0 : i32, i32
  }
}

</mosaic_0001>

<bundles_post_ra>
// kernel: tpu_custom_call.1
= control target key start
LH: loop header
LB: loop body
LE: loop exit
PB: predicated region body
PF: predicated region fallthrough
CT: control target
= control target key end

     0   :  { %10 = vsyncpa [#allocation3], 0  ;;  %s1902_s0 = inlined_call_operand.hbm [shape: bf16[256,256], index: 0, kind: input, shape index: {}]   ;;  %s1903_s1 = inlined_call_operand.hbm [shape: bf16[256,128], index: 1, kind: input, shape index: {}]   ;;  %s1904_s2 = inlined_call_operand.hbm [shape: bf16[128,128], index: 2, kind: input, shape index: {}]   ;;  %s1905_s3 = inlined_call_operand.vmem [shape: f32[1,128], index: 3, kind: input, shape index: {}]   ;;  %s1906_s4 = inlined_call_operand.vmem [shape: f32[1,128], index: 4, kind: input, shape index: {}]   ;;  %s1907_s5 = inlined_call_operand.hbm [shape: f32[256,128], index: 5, kind: output, shape index: {}]  }
   0x1   :  { %11 = vsyncpa [#allocation6], 0 }
   0x2   :  { %12 = vsyncpa [#allocation4], 0  ;;  %s1602_s18 = smov [#allocation5]   ;;  %s1508_s22 = scalar_lea.hbm %s1903_s1, 2048 }
   0x3   :  { %s30_s19 = sshll.u32 %s1602_s18, 4  ;;  %p1509_p0 = scmp.ne.s32.totalorder %s1903_s1, %s1508_s22  ;;  %s31_s19 = int_to_ptr.vmem [resolvable:$true] %s30_s19 }
   0x4   :  { %p1512_p1 = scmp.lt.u32.totalorder %s1508_s22, %s1903_s1 }
   0x6   :  { %p1514_p2 = pnand %p1512_p1, %p1509_p0 }
   0x8   :  { %1517 = shalt.err (!%p1514_p2)
}
   0x9   :  { %s1518_s27 = scalar_lea.vmem %s31_s19, 2048  ;;  %p1523_p4 = scmp.lt.s32.totalorder %s31_s19, %s31_s19 }
   0xa   :  { %p1519_p3 = scmp.ne.s32.totalorder %s31_s19, %s1518_s27  ;;  %p1524_p5 = scmp.lt.s32.totalorder %s1518_s27, %s1518_s27 }
   0xc   :  { %p1525_p6 = por %p1524_p5, %p1523_p4 }
   0xe   :  { %p1526_p7 = pnand %p1525_p6, %p1519_p3 }
  0x10   :  { %1529 = shalt.err (!%p1526_p7)
}
  0x11   :  { %s1603_s28 = smov 64   ;;  %s1604_s29 = smov 4  }
  0x12   :  { %36 = dma.hbm_to_vmem [thread:$0]  %s1903_s1, 2048, %s31_s19, [#allocation6], %s1603_s28, %s1603_s28, %s1604_s29  }
  0x13   :  { %s1605_s7 = smov [#allocation2]   ;;  %s1530_s11 = scalar_lea.hbm %s1902_s0, 4096 }
  0x14   :  { %s18_s8 = sshll.u32 %s1605_s7, 4  ;;  %p1531_p8 = scmp.ne.s32.totalorder %s1902_s0, %s1530_s11  ;;  %s19_s8 = int_to_ptr.vmem [resolvable:$true] %s18_s8 }
  0x15   :  { %p1534_p9 = scmp.lt.u32.totalorder %s1530_s11, %s1902_s0 }
  0x17   :  { %p1536_p10 = pnand %p1534_p9, %p1531_p8 }
  0x19   :  { %1539 = shalt.err (!%p1536_p10)
}
  0x1a   :  { %s1540_s16 = scalar_lea.vmem %s19_s8, 4096  ;;  %p1545_p12 = scmp.lt.s32.totalorder %s19_s8, %s19_s8 }
  0x1b   :  { %p1541_p11 = scmp.ne.s32.totalorder %s19_s8, %s1540_s16  ;;  %p1546_p13 = scmp.lt.s32.totalorder %s1540_s16, %s1540_s16 }
  0x1d   :  { %p1547_p0 = por %p1546_p13, %p1545_p12 }
  0x1f   :  { %p1548_p1 = pnand %p1547_p0, %p1541_p11 }
  0x21   :  { %1551 = shalt.err (!%p1548_p1)
}
  0x22   :  { %s1606_s1 = smov 128   ;;  %s1607_s17 = smov 8  }
  0x23   :  { %24 = dma.hbm_to_vmem [thread:$0]  %s1902_s0, 4096, %s19_s8, [#allocation3], %s1606_s1, %s1606_s1, %s1607_s17  }
  0x24   :  { %s1608_s20 = smov [#allocation7]   ;;  %s1552_s24 = scalar_lea.hbm %s1904_s2, 1024 }
  0x25   :  { %s42_s21 = sshll.u32 %s1608_s20, 4  ;;  %p1553_p2 = scmp.ne.s32.totalorder %s1904_s2, %s1552_s24  ;;  %s43_s21 = int_to_ptr.vmem [resolvable:$true] %s42_s21 }
  0x26   :  { %p1556_p3 = scmp.lt.u32.totalorder %s1552_s24, %s1904_s2 }
  0x28   :  { %p1558_p4 = pnand %p1556_p3, %p1553_p2 }
  0x2a   :  { %1561 = shalt.err (!%p1558_p4)
}
  0x2b   :  { %s1562_s6 = scalar_lea.vmem %s43_s21, 1024  ;;  %p1567_p6 = scmp.lt.s32.totalorder %s43_s21, %s43_s21 }
  0x2c   :  { %p1563_p5 = scmp.ne.s32.totalorder %s43_s21, %s1562_s6  ;;  %p1568_p7 = scmp.lt.s32.totalorder %s1562_s6, %s1562_s6 }
  0x2e   :  { %p1569_p8 = por %p1568_p7, %p1567_p6 }
  0x30   :  { %p1570_p9 = pnand %p1569_p8, %p1563_p5 }
  0x32   :  { %1573 = shalt.err (!%p1570_p9)
}
  0x33   :  { %48 = dma.hbm_to_vmem [thread:$0]  %s1904_s2, 1024, %s43_s21, [#allocation6], %s1603_s28, %s1603_s28, %s1604_s29  }
  0x34   :  { %1596 = dma.done.wait [#allocation3], 4096  }
  0x35   :  { %1597 = vsyncadd [#allocation3], 4294963200 }
  0x36   :  { %1598 = dma.done.wait [#allocation6], 3072  }
  0x37   :  { %1599 = vsyncadd [#allocation6], 4294964224  ;;  %v1436_v0 = vld [vmem:[#allocation5 + $0x40] sm:$0xff]   ;;  %v1438_v2 = vld [vmem:[#allocation5 + $0x48] sm:$0xff]  }
  0x38   :  { %v1437_v1 = vld [vmem:[#allocation5] sm:$0xff]   ;;  %1116 = vmatprep.subr.bf16.mxu0 %v1436_v0  ;;  %v1439_v3 = vld [vmem:[#allocation5 + $0x8] sm:$0xff]   ;;  %v1440_v4 = vld [vmem:[#allocation5 + $0x50] sm:$0xff]  }
  0x39   :  { %1117 = vmatpush3.bf16.msra.mxu0 %v1437_v1  ;;  %v1441_v5 = vld [vmem:[#allocation5 + $0x10] sm:$0xff]   ;;  %v1442_v6 = vld [vmem:[#allocation5 + $0x58] sm:$0xff]   ;;  %v1444_v8 = vld [vmem:[#allocation5 + $0x60] sm:$0xff]  }
  0x3a   :  { %1118 = vmatprep.subr.bf16.mxu0 %v1438_v2  ;;  %v1443_v7 = vld [vmem:[#allocation5 + $0x18] sm:$0xff]   ;;  %v1445_v9 = vld [vmem:[#allocation5 + $0x20] sm:$0xff]   ;;  %v1446_v10 = vld [vmem:[#allocation5 + $0x68] sm:$0xff]  }
  0x3b   :  { %v1685_v11 = vld [vmem:[#allocation2 + $0x4] ss:$8 sps:$4 sm:$0xff]   ;;  %v1448_v13 = vld [vmem:[#allocation5 + $0x70] sm:$0xff]   ;;  %v1450_v15 = vld [vmem:[#allocation5 + $0x78] sm:$0xff]  }
  0x3c   :  { %v1447_v12 = vld [vmem:[#allocation5 + $0x28] sm:$0xff]   ;;  %422 = vmatprep.mubr.bf16.mxu0 %v1685_v11  ;;  %v1449_v14 = vld [vmem:[#allocation5 + $0x30] sm:$0xff]   ;;  %v1451_v16 = vld [vmem:[#allocation5 + $0x38] sm:$0xff]  }
  0x3d   :  { %1119 = vmatpush3.bf16.msra.mxu0 %v1439_v3  ;;  %v1688_v17 = vld [vmem:[#allocation2] ss:$8 sps:$4 sm:$0xff]   ;;  %v1690_v18 = vld [vmem:[#allocation2 + $0x14] ss:$8 sps:$4 sm:$0xff]   ;;  %v1694_v19 = vld [vmem:[#allocation2 + $0x10] ss:$8 sps:$4 sm:$0xff]  }
  0x3e   :  { %1120 = vmatprep.subr.bf16.mxu0 %v1440_v4  ;;  %v1696_v20 = vld [vmem:[#allocation2 + $0x24] ss:$8 sps:$4 sm:$0xff]   ;;  %v1502_v23 = vld [vmem:[#allocation7 + $0x10] sm:$0xff]   ;;  %v1700_v24 = vld [vmem:[#allocation2 + $0x20] ss:$8 sps:$4 sm:$0xff]  }
  0x3f   :  { %v1500_v21 = vld [vmem:[#allocation7] sm:$0xff]   ;;  %v1501_v22 = vld [vmem:[#allocation7 + $0x8] sm:$0xff]   ;;  %v1702_v25 = vld [vmem:[#allocation2 + $0x34] ss:$8 sps:$4 sm:$0xff]  }
  0x40   :  { %1412 = vmatprep.subr.bf16.mxu1 %v1500_v21  ;;  %v1706_v26 = vld [vmem:[#allocation2 + $0x30] ss:$8 sps:$4 sm:$0xff]   ;;  %v1708_v27 = vld [vmem:[#allocation2 + $0x44] ss:$8 sps:$4 sm:$0xff]   ;;  %v1712_v28 = vld [vmem:[#allocation2 + $0x40] ss:$8 sps:$4 sm:$0xff]  }
  0x41   :  { %1121 = vmatpush3.bf16.msra.mxu0 %v1441_v5  ;;  %1420 = vmatpush3.bf16.msra.mxu1 %v1500_v21  ;;  %v1714_v29 = vld [vmem:[#allocation2 + $0x54] ss:$8 sps:$4 sm:$0xff]   ;;  %v1718_v30 = vld [vmem:[#allocation2 + $0x50] ss:$8 sps:$4 sm:$0xff]   ;;  %v1720_v31 = vld [vmem:[#allocation2 + $0x64] ss:$8 sps:$4 sm:$0xff]  }
  0x42   :  { %1122 = vmatprep.subr.bf16.mxu0 %v1442_v6  ;;  %1413 = vmatprep.subr.bf16.mxu1 %v1501_v22  ;;  %v1724_v32 = vld [vmem:[#allocation2 + $0x60] ss:$8 sps:$4 sm:$0xff]   ;;  %v1726_v33 = vld [vmem:[#allocation2 + $0x74] ss:$8 sps:$4 sm:$0xff]   ;;  %v1730_v34 = vld [vmem:[#allocation2 + $0x70] ss:$8 sps:$4 sm:$0xff]  }
  0x43   :  { %v1732_v35 = vld [vmem:[#allocation2 + $0x84] ss:$8 sps:$4 sm:$0xff]   ;;  %v1736_v36 = vld [vmem:[#allocation2 + $0x80] ss:$8 sps:$4 sm:$0xff]   ;;  %v1738_v37 = vld [vmem:[#allocation2 + $0x94] ss:$8 sps:$4 sm:$0xff]  }
  0x44   :  { %v1742_v38 = vld [vmem:[#allocation2 + $0x90] ss:$8 sps:$4 sm:$0xff]   ;;  %v1744_v39 = vld [vmem:[#allocation2 + $0xa4] ss:$8 sps:$4 sm:$0xff]   ;;  %v1748_v40 = vld [vmem:[#allocation2 + $0xa0] ss:$8 sps:$4 sm:$0xff]  }
  0x45   :  { %1123 = vmatpush3.bf16.msra.mxu0 %v1443_v7  ;;  %1421 = vmatpush3.bf16.msra.mxu1 %v1501_v22  ;;  %v1750_v41 = vld [vmem:[#allocation2 + $0xb4] ss:$8 sps:$4 sm:$0xff]   ;;  %v1754_v43 = vld [vmem:[#allocation2 + $0xb0] ss:$8 sps:$4 sm:$0xff]   ;;  %v1756_v44 = vld [vmem:[#allocation2 + $0xc4] ss:$8 sps:$4 sm:$0xff]  }
  0x46   :  { %1124 = vmatprep.subr.bf16.mxu0 %v1444_v8  ;;  %1414 = vmatprep.subr.bf16.mxu1 %v1502_v23  ;;  %v1503_v42 = vld [vmem:[#allocation7 + $0x18] sm:$0xff]   ;;  %v1504_v45 = vld [vmem:[#allocation7 + $0x20] sm:$0xff]   ;;  %v1505_v46 = vld [vmem:[#allocation7 + $0x28] sm:$0xff]  }
  0x47   :  { %v1760_v47 = vld [vmem:[#allocation2 + $0xc0] ss:$8 sps:$4 sm:$0xff]   ;;  %v1762_v48 = vld [vmem:[#allocation2 + $0xd4] ss:$8 sps:$4 sm:$0xff]   ;;  %v1766_v51 = vld [vmem:[#allocation2 + $0xd0] ss:$8 sps:$4 sm:$0xff]  }
  0x48   :  { %v1506_v49 = vld [vmem:[#allocation7 + $0x30] sm:$0xff]   ;;  %v1507_v50 = vld [vmem:[#allocation7 + $0x38] sm:$0xff]   ;;  %v1768_v52 = vld [vmem:[#allocation2 + $0xe4] ss:$8 sps:$4 sm:$0xff]  }
  0x49   :  { %1125 = vmatpush3.bf16.msra.mxu0 %v1445_v9  ;;  %1422 = vmatpush3.bf16.msra.mxu1 %v1502_v23  ;;  %v1772_v53 = vld [vmem:[#allocation2 + $0xe0] ss:$8 sps:$4 sm:$0xff]   ;;  %v1774_v54 = vld [vmem:[#allocation2 + $0xf4] ss:$8 sps:$4 sm:$0xff]   ;;  %v1778_v55 = vld [vmem:[#allocation2 + $0xf0] ss:$8 sps:$4 sm:$0xff]  }
  0x4a   :  { %1126 = vmatprep.subr.bf16.mxu0 %v1446_v10  ;;  %1415 = vmatprep.subr.bf16.mxu1 %v1503_v42  ;;  %v1784_v57 = vld [vmem:[%s1905_s3] ss:$0 sm:$0xff] }
  0x4d   :  { %1127 = vmatpush3.bf16.msra.mxu0 %v1447_v12  ;;  %1423 = vmatpush3.bf16.msra.mxu1 %v1503_v42 }
  0x4e   :  { %1128 = vmatprep.subr.bf16.mxu0 %v1448_v13  ;;  %1416 = vmatprep.subr.bf16.mxu1 %v1504_v45 }
  0x51   :  { %1129 = vmatpush3.bf16.msra.mxu0 %v1449_v14  ;;  %1424 = vmatpush3.bf16.msra.mxu1 %v1504_v45 }
  0x52   :  { %1130 = vmatprep.subr.bf16.mxu0 %v1450_v15  ;;  %1417 = vmatprep.subr.bf16.mxu1 %v1505_v46 }
  0x55   :  { %1131 = vmatpush3.bf16.msra.mxu0 %v1451_v16  ;;  %1425 = vmatpush3.bf16.msra.mxu1 %v1505_v46 }
  0x56   :  { %1364 = vmatprep.subr.bf16.mxu0 %v1500_v21  ;;  %1418 = vmatprep.subr.bf16.mxu1 %v1506_v49 }
  0x58   :  { %423 = vmatmul.mubr.bf16.vlgmr.msra.gmra.mrb[0].mxu0 %v1688_v17 }
  0x59   :  { %430 = vmatprep.mubr.bf16.mxu0 %v1690_v18  ;;  %1365 = vmatpush3.bf16.msra.mxu0 %v1500_v21 }
  0x5a   :  { %1366 = vmatprep.subr.bf16.mxu0 %v1501_v22  ;;  %1426 = vmatpush3.bf16.msra.mxu1 %v1506_v49 }
  0x5b   :  { %1419 = vmatprep.subr.bf16.mxu1 %v1507_v50 }
  0x5d   :  { %1367 = vmatpush3.bf16.msra.mxu0 %v1501_v22 }
  0x5e   :  { %1368 = vmatprep.subr.bf16.mxu0 %v1502_v23  ;;  %1427 = vmatpush3.bf16.msra.mxu1 %v1507_v50 }
  0x60   :  { %431 = vmatmul.mubr.bf16.gmra.mrb[4].mxu0 %v1694_v19 }
  0x61   :  { %438 = vmatprep.mubr.bf16.mxu0 %v1696_v20  ;;  %1369 = vmatpush3.bf16.msra.mxu0 %v1502_v23 }
  0x62   :  { %1370 = vmatprep.subr.bf16.mxu0 %v1503_v42 }
  0x65   :  { %1371 = vmatpush3.bf16.msra.mxu0 %v1503_v42 }
  0x66   :  { %1372 = vmatprep.subr.bf16.mxu0 %v1504_v45 }
  0x68   :  { %439 = vmatmul.mubr.bf16.gmra.mrb[8].mxu0 %v1700_v24 }
  0x69   :  { %446 = vmatprep.mubr.bf16.mxu0 %v1702_v25  ;;  %1373 = vmatpush3.bf16.msra.mxu0 %v1504_v45 }
  0x6a   :  { %1374 = vmatprep.subr.bf16.mxu0 %v1505_v46 }
  0x6d   :  { %1375 = vmatpush3.bf16.msra.mxu0 %v1505_v46 }
  0x6e   :  { %1376 = vmatprep.subr.bf16.mxu0 %v1506_v49 }
  0x70   :  { %447 = vmatmul.mubr.bf16.gmra.mrb[12].mxu0 %v1706_v26 }
  0x71   :  { %454 = vmatprep.mubr.bf16.mxu0 %v1708_v27  ;;  %1377 = vmatpush3.bf16.msra.mxu0 %v1506_v49 }
  0x72   :  { %1378 = vmatprep.subr.bf16.mxu0 %v1507_v50 }
  0x75   :  { %1379 = vmatpush3.bf16.msra.mxu0 %v1507_v50 }
  0x78   :  { %455 = vmatmul.mubr.bf16.gmra.mrb[16].mxu0 %v1712_v28 }
  0x79   :  { %462 = vmatprep.mubr.bf16.mxu0 %v1714_v29 }
  0x80   :  { %463 = vmatmul.mubr.bf16.gmra.mrb[20].mxu0 %v1718_v30 }
  0x81   :  { %470 = vmatprep.mubr.bf16.mxu0 %v1720_v31 }
  0x88   :  { %471 = vmatmul.mubr.bf16.gmra.mrb[24].mxu0 %v1724_v32 }
  0x89   :  { %478 = vmatprep.mubr.bf16.mxu0 %v1726_v33 }
  0x90   :  { %479 = vmatmul.mubr.bf16.gmra.mrb[28].mxu0 %v1730_v34 }
  0x91   :  { %486 = vmatprep.mubr.bf16.mxu0 %v1732_v35 }
  0x98   :  { %487 = vmatmul.mubr.bf16.gmra.mrb[32].mxu0 %v1736_v36 }
  0x99   :  { %494 = vmatprep.mubr.bf16.mxu0 %v1738_v37 }
  0xa0   :  { %495 = vmatmul.mubr.bf16.gmra.mrb[36].mxu0 %v1742_v38 }
  0xa1   :  { %502 = vmatprep.mubr.bf16.mxu0 %v1744_v39 }
  0xa8   :  { %503 = vmatmul.mubr.bf16.gmra.mrb[40].mxu0 %v1748_v40 }
  0xa9   :  { %510 = vmatprep.mubr.bf16.mxu0 %v1750_v41 }
  0xb0   :  { %511 = vmatmul.mubr.bf16.gmra.mrb[44].mxu0 %v1754_v43 }
  0xb1   :  { %518 = vmatprep.mubr.bf16.mxu0 %v1756_v44 }
  0xb8   :  { %519 = vmatmul.mubr.bf16.gmra.mrb[48].mxu0 %v1760_v47 }
  0xb9   :  { %526 = vmatprep.mubr.bf16.mxu0 %v1762_v48 }
  0xc0   :  { %527 = vmatmul.mubr.bf16.gmra.mrb[52].mxu0 %v1766_v51 }
  0xc1   :  { %534 = vmatprep.mubr.bf16.mxu0 %v1768_v52 }
  0xc8   :  { %535 = vmatmul.mubr.bf16.gmra.mrb[56].mxu0 %v1772_v53 }
  0xc9   :  { %542 = vmatprep.mubr.bf16.mxu0 %v1774_v54 }
  0xd0   :  { %543 = vmatmul.mubr.bf16.gmra.mrb[60].mxu0 %v1778_v55 }
 0x12b   :  { %v1132_v56 = vpop.f32.mrb[0].mxu0 }
 0x12c   :  { %v1133_v58 = vpop.f32.mrb[1].mxu0 }
 0x12d   :  { %v1134_v59 = vadd.f32 %v1133_v58, %v1132_v56  ;;  %v1135_v60 = vpop.f32.mrb[2].mxu0 }
 0x12e   :  { %v1136_v61 = vpop.f32.mrb[3].mxu0 }
 0x12f   :  { %v425_v62 = vadd.f32 %v1134_v59, %v1784_v57  ;;  %v1137_v63 = vadd.f32 %v1136_v61, %v1135_v60 }
 0x131   :  { %v428_v0 = vadd.f32 %v1137_v63, %v1784_v57  ;;  %v551_v1 = vmax.f32 %v425_v62, 0.0 }
 0x133   :  { %v552_v2 = vmax.f32 %v428_v0, 0.0  ;;  %v1138_v3 = vpop.f32.mrb[4].mxu0 }
 0x134   :  { %v1139_v4 = vpop.f32.mrb[5].mxu0 }
 0x135   :  { %v1140_v5 = vadd.f32 %v1139_v4, %v1138_v3  ;;  %v1141_v6 = vpop.f32.mrb[6].mxu0  ;;  %v583_v7 = vpack.c.bf16 %v552_v2, %v551_v1 }
 0x136   :  { %v1142_v8 = vpop.f32.mrb[7].mxu0 }
 0x137   :  { %v433_v9 = vadd.f32 %v1140_v5, %v1784_v57  ;;  %v1143_v10 = vadd.f32 %v1142_v8, %v1141_v6  ;;  %1380 = vmatprep.mubr.bf16.mxu0 %v583_v7 }
 0x139   :  { %v436_v12 = vadd.f32 %v1143_v10, %v1784_v57  ;;  %v553_v13 = vmax.f32 %v433_v9, 0.0 }
 0x13b   :  { %v554_v14 = vmax.f32 %v436_v12, 0.0  ;;  %v1144_v15 = vpop.f32.mrb[8].mxu0 }
 0x13c   :  { %v1145_v16 = vpop.f32.mrb[9].mxu0 }
 0x13d   :  { %v584_v21 = vpack.c.bf16 %v554_v14, %v553_v13  ;;  %v1146_v22 = vadd.f32 %v1145_v16, %v1144_v15  ;;  %v1147_v23 = vpop.f32.mrb[10].mxu0 }
 0x13e   :  { %v1148_v42 = vpop.f32.mrb[11].mxu0 }
 0x13f   :  { %v441_v45 = vadd.f32 %v1146_v22, %v1784_v57  ;;  %v1149_v46 = vadd.f32 %v1148_v42, %v1147_v23  ;;  %1381 = vmatmul.mubr.bf16.vlgmr.msra.gmra.mrb[64].mxu0 %v584_v21 }
 0x141   :  { %v444_v49 = vadd.f32 %v1149_v46, %v1784_v57  ;;  %v555_v50 = vmax.f32 %v441_v45, 0.0 }
 0x143   :  { %v556_v56 = vmax.f32 %v444_v49, 0.0  ;;  %v1150_v58 = vpop.f32.mrb[12].mxu0 }
 0x144   :  { %v1151_v59 = vpop.f32.mrb[13].mxu0 }
 0x145   :  { %v1152_v60 = vadd.f32 %v1151_v59, %v1150_v58  ;;  %v1153_v61 = vpop.f32.mrb[14].mxu0  ;;  %v585_v62 = vpack.c.bf16 %v556_v56, %v555_v50 }
 0x146   :  { %v1154_v63 = vpop.f32.mrb[15].mxu0 }
 0x147   :  { %v449_v0 = vadd.f32 %v1152_v60, %v1784_v57  ;;  %v1155_v1 = vadd.f32 %v1154_v63, %v1153_v61  ;;  %1384 = vmatprep.mubr.bf16.mxu0 %v585_v62 }
 0x149   :  { %v452_v2 = vadd.f32 %v1155_v1, %v1784_v57  ;;  %v557_v3 = vmax.f32 %v449_v0, 0.0 }
 0x14b   :  { %v558_v4 = vmax.f32 %v452_v2, 0.0  ;;  %v1156_v5 = vpop.f32.mrb[16].mxu0 }
 0x14c   :  { %v1157_v6 = vpop.f32.mrb[17].mxu0 }
 0x14d   :  { %v1158_v7 = vadd.f32 %v1157_v6, %v1156_v5  ;;  %v1159_v8 = vpop.f32.mrb[18].mxu0  ;;  %v586_v9 = vpack.c.bf16 %v558_v4, %v557_v3 }
 0x14e   :  { %v1160_v10 = vpop.f32.mrb[19].mxu0 }
 0x14f   :  { %v457_v12 = vadd.f32 %v1158_v7, %v1784_v57  ;;  %v1161_v13 = vadd.f32 %v1160_v10, %v1159_v8  ;;  %1385 = vmatmul.mubr.bf16.gmra.mrb[68].mxu0 %v586_v9 }
 0x151   :  { %v460_v14 = vadd.f32 %v1161_v13, %v1784_v57  ;;  %v559_v15 = vmax.f32 %v457_v12, 0.0 }
 0x153   :  { %v560_v16 = vmax.f32 %v460_v14, 0.0  ;;  %v1162_v21 = vpop.f32.mrb[20].mxu0 }
 0x154   :  { %v1163_v22 = vpop.f32.mrb[21].mxu0 }
 0x155   :  { %v1164_v23 = vadd.f32 %v1163_v22, %v1162_v21  ;;  %v1165_v42 = vpop.f32.mrb[22].mxu0  ;;  %v587_v45 = vpack.c.bf16 %v560_v16, %v559_v15 }
 0x156   :  { %v1166_v46 = vpop.f32.mrb[23].mxu0 }
 0x157   :  { %v465_v49 = vadd.f32 %v1164_v23, %v1784_v57  ;;  %v1167_v50 = vadd.f32 %v1166_v46, %v1165_v42  ;;  %1388 = vmatprep.mubr.bf16.mxu0 %v587_v45 }
 0x159   :  { %v468_v56 = vadd.f32 %v1167_v50, %v1784_v57  ;;  %v561_v58 = vmax.f32 %v465_v49, 0.0 }
 0x15b   :  { %v562_v59 = vmax.f32 %v468_v56, 0.0  ;;  %v1168_v60 = vpop.f32.mrb[24].mxu0 }
 0x15c   :  { %v1169_v61 = vpop.f32.mrb[25].mxu0 }
 0x15d   :  { %v1170_v62 = vadd.f32 %v1169_v61, %v1168_v60  ;;  %v1171_v63 = vpop.f32.mrb[26].mxu0  ;;  %v588_v0 = vpack.c.bf16 %v562_v59, %v561_v58 }
 0x15e   :  { %v1172_v1 = vpop.f32.mrb[27].mxu0 }
 0x15f   :  { %v473_v2 = vadd.f32 %v1170_v62, %v1784_v57  ;;  %v1173_v3 = vadd.f32 %v1172_v1, %v1171_v63  ;;  %1389 = vmatmul.mubr.bf16.gmra.mrb[72].mxu0 %v588_v0 }
 0x161   :  { %v476_v4 = vadd.f32 %v1173_v3, %v1784_v57  ;;  %v563_v5 = vmax.f32 %v473_v2, 0.0 }
 0x163   :  { %v564_v6 = vmax.f32 %v476_v4, 0.0  ;;  %v1174_v7 = vpop.f32.mrb[28].mxu0 }
 0x164   :  { %v1175_v8 = vpop.f32.mrb[29].mxu0 }
 0x165   :  { %v1176_v9 = vadd.f32 %v1175_v8, %v1174_v7  ;;  %v1177_v10 = vpop.f32.mrb[30].mxu0  ;;  %v589_v12 = vpack.c.bf16 %v564_v6, %v563_v5 }
 0x166   :  { %v1178_v13 = vpop.f32.mrb[31].mxu0 }
 0x167   :  { %v481_v14 = vadd.f32 %v1176_v9, %v1784_v57  ;;  %v1179_v15 = vadd.f32 %v1178_v13, %v1177_v10  ;;  %1392 = vmatprep.mubr.bf16.mxu0 %v589_v12 }
 0x169   :  { %v484_v16 = vadd.f32 %v1179_v15, %v1784_v57  ;;  %v565_v21 = vmax.f32 %v481_v14, 0.0 }
 0x16b   :  { %v566_v22 = vmax.f32 %v484_v16, 0.0  ;;  %v1180_v23 = vpop.f32.mrb[32].mxu0 }
 0x16c   :  { %v1181_v42 = vpop.f32.mrb[33].mxu0 }
 0x16d   :  { %v1182_v45 = vadd.f32 %v1181_v42, %v1180_v23  ;;  %v1183_v46 = vpop.f32.mrb[34].mxu0  ;;  %v590_v49 = vpack.c.bf16 %v566_v22, %v565_v21 }
 0x16e   :  { %v1184_v50 = vpop.f32.mrb[35].mxu0 }
 0x16f   :  { %v1185_v56 = vadd.f32 %v1184_v50, %v1183_v46  ;;  %1393 = vmatmul.mubr.bf16.gmra.mrb[76].mxu0 %v590_v49  ;;  %v489_v58 = vadd.f32 %v1182_v45, %v1784_v57 }
 0x171   :  { %v492_v59 = vadd.f32 %v1185_v56, %v1784_v57  ;;  %v567_v61 = vmax.f32 %v489_v58, 0.0 }
 0x173   :  { %v1186_v60 = vpop.f32.mrb[36].mxu0  ;;  %v568_v62 = vmax.f32 %v492_v59, 0.0 }
 0x174   :  { %v1187_v63 = vpop.f32.mrb[37].mxu0 }
 0x175   :  { %v1188_v0 = vadd.f32 %v1187_v63, %v1186_v60  ;;  %v1189_v1 = vpop.f32.mrb[38].mxu0  ;;  %v591_v2 = vpack.c.bf16 %v568_v62, %v567_v61 }
 0x176   :  { %v1190_v3 = vpop.f32.mrb[39].mxu0 }
 0x177   :  { %v497_v4 = vadd.f32 %v1188_v0, %v1784_v57  ;;  %v1191_v5 = vadd.f32 %v1190_v3, %v1189_v1  ;;  %1396 = vmatprep.mubr.bf16.mxu1 %v591_v2 }
 0x179   :  { %v500_v6 = vadd.f32 %v1191_v5, %v1784_v57  ;;  %v569_v7 = vmax.f32 %v497_v4, 0.0 }
 0x17b   :  { %v570_v8 = vmax.f32 %v500_v6, 0.0  ;;  %v1192_v9 = vpop.f32.mrb[40].mxu0 }
 0x17c   :  { %v1193_v10 = vpop.f32.mrb[41].mxu0 }
 0x17d   :  { %v1194_v12 = vadd.f32 %v1193_v10, %v1192_v9  ;;  %v1195_v13 = vpop.f32.mrb[42].mxu0  ;;  %v592_v14 = vpack.c.bf16 %v570_v8, %v569_v7 }
 0x17e   :  { %v1196_v15 = vpop.f32.mrb[43].mxu0 }
 0x17f   :  { %v505_v16 = vadd.f32 %v1194_v12, %v1784_v57  ;;  %v1197_v21 = vadd.f32 %v1196_v15, %v1195_v13  ;;  %1397 = vmatmul.mubr.bf16.vlgmr.msra.gmra.mrb[0].mxu1 %v592_v14 }
 0x181   :  { %v508_v22 = vadd.f32 %v1197_v21, %v1784_v57  ;;  %v571_v23 = vmax.f32 %v505_v16, 0.0 }
 0x183   :  { %v572_v42 = vmax.f32 %v508_v22, 0.0  ;;  %v1198_v45 = vpop.f32.mrb[44].mxu0 }
 0x184   :  { %v1199_v46 = vpop.f32.mrb[45].mxu0 }
 0x185   :  { %v1200_v49 = vadd.f32 %v1199_v46, %v1198_v45  ;;  %v1201_v50 = vpop.f32.mrb[46].mxu0  ;;  %v593_v56 = vpack.c.bf16 %v572_v42, %v571_v23 }
 0x186   :  { %v1202_v58 = vpop.f32.mrb[47].mxu0 }
 0x187   :  { %v513_v59 = vadd.f32 %v1200_v49, %v1784_v57  ;;  %v1203_v60 = vadd.f32 %v1202_v58, %v1201_v50  ;;  %1400 = vmatprep.mubr.bf16.mxu1 %v593_v56 }
 0x189   :  { %v516_v61 = vadd.f32 %v1203_v60, %v1784_v57  ;;  %v573_v62 = vmax.f32 %v513_v59, 0.0 }
 0x18b   :  { %v574_v63 = vmax.f32 %v516_v61, 0.0  ;;  %v1204_v0 = vpop.f32.mrb[48].mxu0 }
 0x18c   :  { %v1205_v1 = vpop.f32.mrb[49].mxu0 }
 0x18d   :  { %v1206_v2 = vadd.f32 %v1205_v1, %v1204_v0  ;;  %v1207_v3 = vpop.f32.mrb[50].mxu0  ;;  %v594_v4 = vpack.c.bf16 %v574_v63, %v573_v62 }
 0x18e   :  { %v1208_v5 = vpop.f32.mrb[51].mxu0 }
 0x18f   :  { %v521_v6 = vadd.f32 %v1206_v2, %v1784_v57  ;;  %v1209_v7 = vadd.f32 %v1208_v5, %v1207_v3  ;;  %1401 = vmatmul.mubr.bf16.gmra.mrb[4].mxu1 %v594_v4 }
 0x191   :  { %v524_v8 = vadd.f32 %v1209_v7, %v1784_v57  ;;  %v575_v9 = vmax.f32 %v521_v6, 0.0 }
 0x193   :  { %v576_v10 = vmax.f32 %v524_v8, 0.0  ;;  %v1210_v12 = vpop.f32.mrb[52].mxu0 }
 0x194   :  { %v1211_v13 = vpop.f32.mrb[53].mxu0 }
 0x195   :  { %v1212_v14 = vadd.f32 %v1211_v13, %v1210_v12  ;;  %v1213_v15 = vpop.f32.mrb[54].mxu0  ;;  %v595_v16 = vpack.c.bf16 %v576_v10, %v575_v9 }
 0x196   :  { %v1214_v21 = vpop.f32.mrb[55].mxu0 }
 0x197   :  { %v529_v22 = vadd.f32 %v1212_v14, %v1784_v57  ;;  %v1215_v23 = vadd.f32 %v1214_v21, %v1213_v15  ;;  %1404 = vmatprep.mubr.bf16.mxu1 %v595_v16 }
 0x199   :  { %v532_v42 = vadd.f32 %v1215_v23, %v1784_v57  ;;  %v577_v45 = vmax.f32 %v529_v22, 0.0 }
 0x19b   :  { %v578_v46 = vmax.f32 %v532_v42, 0.0  ;;  %v1216_v49 = vpop.f32.mrb[56].mxu0 }
 0x19c   :  { %v1217_v50 = vpop.f32.mrb[57].mxu0 }
 0x19d   :  { %v1218_v56 = vadd.f32 %v1217_v50, %v1216_v49  ;;  %v1219_v58 = vpop.f32.mrb[58].mxu0  ;;  %v596_v59 = vpack.c.bf16 %v578_v46, %v577_v45 }
 0x19e   :  { %v1220_v60 = vpop.f32.mrb[59].mxu0 }
 0x19f   :  { %v537_v61 = vadd.f32 %v1218_v56, %v1784_v57  ;;  %v1221_v62 = vadd.f32 %v1220_v60, %v1219_v58  ;;  %1405 = vmatmul.mubr.bf16.gmra.mrb[8].mxu1 %v596_v59 }
 0x1a1   :  { %v540_v63 = vadd.f32 %v1221_v62, %v1784_v57  ;;  %v579_v0 = vmax.f32 %v537_v61, 0.0 }
 0x1a3   :  { %v580_v1 = vmax.f32 %v540_v63, 0.0  ;;  %v1222_v2 = vpop.f32.mrb[60].mxu0 }
 0x1a4   :  { %v1223_v3 = vpop.f32.mrb[61].mxu0 }
 0x1a5   :  { %v1224_v4 = vadd.f32 %v1223_v3, %v1222_v2  ;;  %v1225_v5 = vpop.f32.mrb[62].mxu0  ;;  %v597_v6 = vpack.c.bf16 %v580_v1, %v579_v0 }
 0x1a6   :  { %v1226_v7 = vpop.f32.mrb[63].mxu0 }
 0x1a7   :  { %v545_v8 = vadd.f32 %v1224_v4, %v1784_v57  ;;  %v1227_v9 = vadd.f32 %v1226_v7, %v1225_v5  ;;  %1408 = vmatprep.mubr.bf16.mxu1 %v597_v6 }
 0x1a9   :  { %v548_v10 = vadd.f32 %v1227_v9, %v1784_v57  ;;  %v581_v12 = vmax.f32 %v545_v8, 0.0 }
 0x1ab   :  { %v582_v13 = vmax.f32 %v548_v10, 0.0 }
 0x1ad   :  { %v598_v14 = vpack.c.bf16 %v582_v13, %v581_v12 }
 0x1af   :  { %1409 = vmatmul.mubr.bf16.gmra.mrb[12].mxu1 %v598_v14 }
 0x1b0   :  { %879 = vmatprep.mubr.bf16.mxu1 %v1685_v11 }
 0x212   :  { %v1382_v15 = vpop.f32.mrb[64].mxu0 }
 0x213   :  { %v697_v16 = vpop.f32.mrb[65].mxu0 }
 0x214   :  { %v1383_v21 = vpop.f32.mrb[66].mxu0 }
 0x215   :  { %v825_v22 = vpack.c.bf16 %v1383_v21, %v1382_v15  ;;  %v700_v23 = vpop.f32.mrb[67].mxu0 }
 0x216   :  { %v824_v42 = vpack.c.bf16 %v700_v23, %v697_v16 }
 0x222   :  { %v1386_v45 = vpop.f32.mrb[68].mxu0 }
 0x223   :  { %v713_v46 = vpop.f32.mrb[69].mxu0 }
 0x224   :  { %v1387_v49 = vpop.f32.mrb[70].mxu0 }
 0x225   :  { %v827_v50 = vpack.c.bf16 %v1387_v49, %v1386_v45  ;;  %v716_v56 = vpop.f32.mrb[71].mxu0 }
 0x226   :  { %v826_v58 = vpack.c.bf16 %v716_v56, %v713_v46 }
 0x232   :  { %v1390_v59 = vpop.f32.mrb[72].mxu0 }
 0x233   :  { %v729_v57 = vpop.f32.mrb[73].mxu0 }
 0x234   :  { %v1391_v60 = vpop.f32.mrb[74].mxu0 }
 0x235   :  { %v829_v61 = vpack.c.bf16 %v1391_v60, %v1390_v59  ;;  %v732_v62 = vpop.f32.mrb[75].mxu0 }
 0x236   :  { %v828_v63 = vpack.c.bf16 %v732_v62, %v729_v57 }
 0x242   :  { %v1394_v0 = vpop.f32.mrb[76].mxu0 }
 0x243   :  { %v745_v11 = vpop.f32.mrb[77].mxu0 }
 0x244   :  { %v1395_v1 = vpop.f32.mrb[78].mxu0 }
 0x245   :  { %v831_v2 = vpack.c.bf16 %v1395_v1, %v1394_v0  ;;  %v748_v3 = vpop.f32.mrb[79].mxu0 }
 0x246   :  { %v830_v4 = vpack.c.bf16 %v748_v3, %v745_v11 }
 0x252   :  { %v1398_v5 = vpop.f32.mrb[0].mxu1 }
 0x253   :  { %v761_v6 = vpop.f32.mrb[1].mxu1 }
 0x254   :  { %v1399_v7 = vpop.f32.mrb[2].mxu1 }
 0x255   :  { %v833_v8 = vpack.c.bf16 %v1399_v7, %v1398_v5  ;;  %v764_v9 = vpop.f32.mrb[3].mxu1 }
 0x256   :  { %v832_v10 = vpack.c.bf16 %v764_v9, %v761_v6 }
 0x258   :  { %1252 = vmatprep.subr.bf16.mxu1 %v832_v10 }
 0x259   :  { %1253 = vmatpush3.bf16.msra.mxu1 %v824_v42 }
 0x25a   :  { %1254 = vmatprep.subr.bf16.mxu1 %v833_v8 }
 0x25d   :  { %1255 = vmatpush3.bf16.msra.mxu1 %v825_v22 }
 0x262   :  { %v1402_v12 = vpop.f32.mrb[4].mxu1 }
 0x263   :  { %v777_v13 = vpop.f32.mrb[5].mxu1 }
 0x264   :  { %v1403_v14 = vpop.f32.mrb[6].mxu1 }
 0x265   :  { %v835_v15 = vpack.c.bf16 %v1403_v14, %v1402_v12  ;;  %v780_v16 = vpop.f32.mrb[7].mxu1 }
 0x266   :  { %v834_v21 = vpack.c.bf16 %v780_v16, %v777_v13 }
 0x268   :  { %1256 = vmatprep.subr.bf16.mxu1 %v834_v21 }
 0x269   :  { %1257 = vmatpush3.bf16.msra.mxu1 %v826_v58 }
 0x26a   :  { %1258 = vmatprep.subr.bf16.mxu1 %v835_v15 }
 0x26d   :  { %1259 = vmatpush3.bf16.msra.mxu1 %v827_v50 }
 0x272   :  { %v1406_v23 = vpop.f32.mrb[8].mxu1 }
 0x273   :  { %v793_v45 = vpop.f32.mrb[9].mxu1 }
 0x274   :  { %v1407_v46 = vpop.f32.mrb[10].mxu1 }
 0x275   :  { %v837_v49 = vpack.c.bf16 %v1407_v46, %v1406_v23  ;;  %v796_v56 = vpop.f32.mrb[11].mxu1 }
 0x276   :  { %v836_v59 = vpack.c.bf16 %v796_v56, %v793_v45 }
 0x278   :  { %1260 = vmatprep.subr.bf16.mxu1 %v836_v59 }
 0x279   :  { %1261 = vmatpush3.bf16.msra.mxu1 %v828_v63 }
 0x27a   :  { %1262 = vmatprep.subr.bf16.mxu1 %v837_v49 }
 0x27d   :  { %1263 = vmatpush3.bf16.msra.mxu1 %v829_v61 }
 0x282   :  { %v1410_v22 = vpop.f32.mrb[12].mxu1 }
 0x283   :  { %v809_v42 = vpop.f32.mrb[13].mxu1 }
 0x284   :  { %v1411_v57 = vpop.f32.mrb[14].mxu1 }
 0x285   :  { %v839_v60 = vpack.c.bf16 %v1411_v57, %v1410_v22  ;;  %v812_v62 = vpop.f32.mrb[15].mxu1 }
 0x286   :  { %v838_v0 = vpack.c.bf16 %v812_v62, %v809_v42 }
 0x288   :  { %1264 = vmatprep.subr.bf16.mxu1 %v838_v0 }
 0x289   :  { %1265 = vmatpush3.bf16.msra.mxu1 %v830_v4 }
 0x28a   :  { %1266 = vmatprep.subr.bf16.mxu1 %v839_v60 }
 0x28d   :  { %1267 = vmatpush3.bf16.msra.mxu1 %v831_v2 }
 0x290   :  { %880 = vmatmul.mubr.bf16.vlgmr.msra.gmra.mrb[16].mxu1 %v1688_v17 }
 0x291   :  { %887 = vmatprep.mubr.bf16.mxu1 %v1690_v18  ;;  %v1853_v18 = vld [vmem:[%s1906_s4] ss:$0 sm:$0xff]  ;;  %s1609_s4 = smov [#allocation8]  }
 0x292   :  { %s1045_s8 = sshll.u32 %s1609_s4, 4  ;;  %s1046_s8 = int_to_ptr.vmem [resolvable:$true] %s1045_s8 }
 0x293   :  { %s1574_s9 = scalar_lea.vmem %s1046_s8, 4096  ;;  %p1579_p11 = scmp.lt.s32.totalorder %s1046_s8, %s1046_s8 }
 0x294   :  { %p1575_p10 = scmp.ne.s32.totalorder %s1046_s8, %s1574_s9  ;;  %p1580_p12 = scmp.lt.s32.totalorder %s1574_s9, %s1574_s9 }
 0x296   :  { %p1581_p13 = por %p1580_p12, %p1579_p11 }
 0x298   :  { %888 = vmatmul.mubr.bf16.gmra.mrb[20].mxu1 %v1694_v19  ;;  %p1582_p0 = pnand %p1581_p13, %p1575_p10 }
 0x299   :  { %895 = vmatprep.mubr.bf16.mxu1 %v1696_v20 }
 0x2a0   :  { %896 = vmatmul.mubr.bf16.gmra.mrb[24].mxu1 %v1700_v24 }
 0x2a1   :  { %903 = vmatprep.mubr.bf16.mxu1 %v1702_v25 }
 0x2a8   :  { %904 = vmatmul.mubr.bf16.gmra.mrb[28].mxu1 %v1706_v26 }
 0x2a9   :  { %911 = vmatprep.mubr.bf16.mxu1 %v1708_v27 }
 0x2b0   :  { %912 = vmatmul.mubr.bf16.gmra.mrb[32].mxu1 %v1712_v28 }
 0x2b1   :  { %919 = vmatprep.mubr.bf16.mxu1 %v1714_v29 }
 0x2b8   :  { %920 = vmatmul.mubr.bf16.gmra.mrb[36].mxu1 %v1718_v30 }
 0x2b9   :  { %927 = vmatprep.mubr.bf16.mxu1 %v1720_v31 }
 0x2c0   :  { %928 = vmatmul.mubr.bf16.gmra.mrb[40].mxu1 %v1724_v32 }
 0x2c1   :  { %935 = vmatprep.mubr.bf16.mxu1 %v1726_v33 }
 0x2c8   :  { %936 = vmatmul.mubr.bf16.gmra.mrb[44].mxu1 %v1730_v34 }
 0x2c9   :  { %943 = vmatprep.mubr.bf16.mxu1 %v1732_v35 }
 0x2d0   :  { %944 = vmatmul.mubr.bf16.gmra.mrb[48].mxu1 %v1736_v36 }
 0x2d1   :  { %951 = vmatprep.mubr.bf16.mxu1 %v1738_v37 }
 0x2d8   :  { %952 = vmatmul.mubr.bf16.gmra.mrb[52].mxu1 %v1742_v38 }
 0x2d9   :  { %959 = vmatprep.mubr.bf16.mxu1 %v1744_v39 }
 0x2e0   :  { %960 = vmatmul.mubr.bf16.gmra.mrb[56].mxu1 %v1748_v40 }
 0x2e1   :  { %967 = vmatprep.mubr.bf16.mxu1 %v1750_v41 }
 0x2e8   :  { %968 = vmatmul.mubr.bf16.gmra.mrb[60].mxu1 %v1754_v43 }
 0x2e9   :  { %975 = vmatprep.mubr.bf16.mxu1 %v1756_v44 }
 0x2f0   :  { %976 = vmatmul.mubr.bf16.gmra.mrb[64].mxu1 %v1760_v47 }
 0x2f1   :  { %983 = vmatprep.mubr.bf16.mxu1 %v1762_v48 }
 0x2f8   :  { %984 = vmatmul.mubr.bf16.gmra.mrb[68].mxu1 %v1766_v51 }
 0x2f9   :  { %991 = vmatprep.mubr.bf16.mxu1 %v1768_v52 }
 0x300   :  { %992 = vmatmul.mubr.bf16.gmra.mrb[72].mxu1 %v1772_v53 }
 0x301   :  { %999 = vmatprep.mubr.bf16.mxu1 %v1774_v54 }
 0x308   :  { %1000 = vmatmul.mubr.bf16.gmra.mrb[76].mxu1 %v1778_v55 }
 0x363   :  { %v1268_v17 = vpop.f32.mrb[16].mxu1 }
 0x364   :  { %v1269_v19 = vpop.f32.mrb[17].mxu1 }
 0x365   :  { %v1270_v20 = vadd.f32 %v1269_v19, %v1268_v17  ;;  %v1271_v24 = vpop.f32.mrb[18].mxu1 }
 0x366   :  { %v1272_v25 = vpop.f32.mrb[19].mxu1 }
 0x367   :  { %v882_v26 = vadd.f32 %v1270_v20, %v1853_v18  ;;  %v1273_v27 = vadd.f32 %v1272_v25, %v1271_v24 }
 0x369   :  { %1008 = vst [vmem:[#allocation8] sm:$0xff] %v882_v26  ;;  %v885_v28 = vadd.f32 %v1273_v27, %v1853_v18 }
 0x36b   :  { %1009 = vst [vmem:[#allocation8 + $0x8] sm:$0xff] %v885_v28  ;;  %v1274_v29 = vpop.f32.mrb[20].mxu1 }
 0x36c   :  { %v1275_v30 = vpop.f32.mrb[21].mxu1 }
 0x36d   :  { %v1276_v31 = vadd.f32 %v1275_v30, %v1274_v29  ;;  %v1277_v32 = vpop.f32.mrb[22].mxu1 }
 0x36e   :  { %v1278_v33 = vpop.f32.mrb[23].mxu1 }
 0x36f   :  { %v890_v34 = vadd.f32 %v1276_v31, %v1853_v18  ;;  %v1279_v35 = vadd.f32 %v1278_v33, %v1277_v32 }
 0x371   :  { %1010 = vst [vmem:[#allocation8 + $0x10] sm:$0xff] %v890_v34  ;;  %v893_v36 = vadd.f32 %v1279_v35, %v1853_v18 }
 0x373   :  { %1011 = vst [vmem:[#allocation8 + $0x18] sm:$0xff] %v893_v36  ;;  %v1280_v37 = vpop.f32.mrb[24].mxu1 }
 0x374   :  { %v1281_v38 = vpop.f32.mrb[25].mxu1 }
 0x375   :  { %v1282_v39 = vadd.f32 %v1281_v38, %v1280_v37  ;;  %v1283_v40 = vpop.f32.mrb[26].mxu1 }
 0x376   :  { %v1284_v41 = vpop.f32.mrb[27].mxu1 }
 0x377   :  { %v898_v43 = vadd.f32 %v1282_v39, %v1853_v18  ;;  %v1285_v44 = vadd.f32 %v1284_v41, %v1283_v40 }
 0x379   :  { %1012 = vst [vmem:[#allocation8 + $0x20] sm:$0xff] %v898_v43  ;;  %v901_v47 = vadd.f32 %v1285_v44, %v1853_v18 }
 0x37b   :  { %1013 = vst [vmem:[#allocation8 + $0x28] sm:$0xff] %v901_v47  ;;  %v1286_v48 = vpop.f32.mrb[28].mxu1 }
 0x37c   :  { %v1287_v51 = vpop.f32.mrb[29].mxu1 }
 0x37d   :  { %v1288_v52 = vadd.f32 %v1287_v51, %v1286_v48  ;;  %v1289_v53 = vpop.f32.mrb[30].mxu1 }
 0x37e   :  { %v1290_v54 = vpop.f32.mrb[31].mxu1 }
 0x37f   :  { %v906_v55 = vadd.f32 %v1288_v52, %v1853_v18  ;;  %v1291_v50 = vadd.f32 %v1290_v54, %v1289_v53 }
 0x381   :  { %1014 = vst [vmem:[#allocation8 + $0x30] sm:$0xff] %v906_v55  ;;  %v909_v58 = vadd.f32 %v1291_v50, %v1853_v18 }
 0x383   :  { %1015 = vst [vmem:[#allocation8 + $0x38] sm:$0xff] %v909_v58  ;;  %v1292_v61 = vpop.f32.mrb[32].mxu1 }
 0x384   :  { %v1293_v63 = vpop.f32.mrb[33].mxu1 }
 0x385   :  { %v1294_v11 = vadd.f32 %v1293_v63, %v1292_v61  ;;  %v1295_v1 = vpop.f32.mrb[34].mxu1 }
 0x386   :  { %v1296_v2 = vpop.f32.mrb[35].mxu1 }
 0x387   :  { %v914_v3 = vadd.f32 %v1294_v11, %v1853_v18  ;;  %v1297_v4 = vadd.f32 %v1296_v2, %v1295_v1 }
 0x389   :  { %1016 = vst [vmem:[#allocation8 + $0x40] sm:$0xff] %v914_v3  ;;  %v917_v5 = vadd.f32 %v1297_v4, %v1853_v18 }
 0x38b   :  { %1017 = vst [vmem:[#allocation8 + $0x48] sm:$0xff] %v917_v5  ;;  %v1298_v6 = vpop.f32.mrb[36].mxu1 }
 0x38c   :  { %v1299_v7 = vpop.f32.mrb[37].mxu1 }
 0x38d   :  { %v1300_v8 = vadd.f32 %v1299_v7, %v1298_v6  ;;  %v1301_v9 = vpop.f32.mrb[38].mxu1 }
 0x38e   :  { %v1302_v10 = vpop.f32.mrb[39].mxu1 }
 0x38f   :  { %v922_v12 = vadd.f32 %v1300_v8, %v1853_v18  ;;  %v1303_v13 = vadd.f32 %v1302_v10, %v1301_v9 }
 0x391   :  { %1018 = vst [vmem:[#allocation8 + $0x50] sm:$0xff] %v922_v12  ;;  %v925_v14 = vadd.f32 %v1303_v13, %v1853_v18 }
 0x393   :  { %1019 = vst [vmem:[#allocation8 + $0x58] sm:$0xff] %v925_v14  ;;  %v1304_v15 = vpop.f32.mrb[40].mxu1 }
 0x394   :  { %v1305_v16 = vpop.f32.mrb[41].mxu1 }
 0x395   :  { %v1306_v21 = vadd.f32 %v1305_v16, %v1304_v15  ;;  %v1307_v23 = vpop.f32.mrb[42].mxu1 }
 0x396   :  { %v1308_v45 = vpop.f32.mrb[43].mxu1 }
 0x397   :  { %v930_v46 = vadd.f32 %v1306_v21, %v1853_v18  ;;  %v1309_v49 = vadd.f32 %v1308_v45, %v1307_v23 }
 0x399   :  { %1020 = vst [vmem:[#allocation8 + $0x60] sm:$0xff] %v930_v46  ;;  %v933_v56 = vadd.f32 %v1309_v49, %v1853_v18 }
 0x39b   :  { %1021 = vst [vmem:[#allocation8 + $0x68] sm:$0xff] %v933_v56  ;;  %v1310_v59 = vpop.f32.mrb[44].mxu1 }
 0x39c   :  { %v1311_v22 = vpop.f32.mrb[45].mxu1 }
 0x39d   :  { %v1312_v42 = vadd.f32 %v1311_v22, %v1310_v59  ;;  %v1313_v57 = vpop.f32.mrb[46].mxu1 }
 0x39e   :  { %v1314_v60 = vpop.f32.mrb[47].mxu1 }
 0x39f   :  { %v938_v62 = vadd.f32 %v1312_v42, %v1853_v18  ;;  %v1315_v0 = vadd.f32 %v1314_v60, %v1313_v57 }
 0x3a1   :  { %1022 = vst [vmem:[#allocation8 + $0x70] sm:$0xff] %v938_v62  ;;  %v941_v17 = vadd.f32 %v1315_v0, %v1853_v18 }
 0x3a3   :  { %1023 = vst [vmem:[#allocation8 + $0x78] sm:$0xff] %v941_v17  ;;  %v1316_v19 = vpop.f32.mrb[48].mxu1 }
 0x3a4   :  { %v1317_v20 = vpop.f32.mrb[49].mxu1 }
 0x3a5   :  { %v1318_v24 = vadd.f32 %v1317_v20, %v1316_v19  ;;  %v1319_v25 = vpop.f32.mrb[50].mxu1 }
 0x3a6   :  { %v1320_v26 = vpop.f32.mrb[51].mxu1 }
 0x3a7   :  { %v946_v27 = vadd.f32 %v1318_v24, %v1853_v18  ;;  %v1321_v28 = vadd.f32 %v1320_v26, %v1319_v25 }
 0x3a9   :  { %1024 = vst [vmem:[#allocation8 + $0x80] sm:$0xff] %v946_v27  ;;  %v949_v29 = vadd.f32 %v1321_v28, %v1853_v18 }
 0x3ab   :  { %1025 = vst [vmem:[#allocation8 + $0x88] sm:$0xff] %v949_v29  ;;  %v1322_v30 = vpop.f32.mrb[52].mxu1 }
 0x3ac   :  { %v1323_v31 = vpop.f32.mrb[53].mxu1 }
 0x3ad   :  { %v1324_v32 = vadd.f32 %v1323_v31, %v1322_v30  ;;  %v1325_v33 = vpop.f32.mrb[54].mxu1 }
 0x3ae   :  { %v1326_v34 = vpop.f32.mrb[55].mxu1 }
 0x3af   :  { %v954_v35 = vadd.f32 %v1324_v32, %v1853_v18  ;;  %v1327_v36 = vadd.f32 %v1326_v34, %v1325_v33 }
 0x3b1   :  { %1026 = vst [vmem:[#allocation8 + $0x90] sm:$0xff] %v954_v35  ;;  %v957_v37 = vadd.f32 %v1327_v36, %v1853_v18 }
 0x3b3   :  { %1027 = vst [vmem:[#allocation8 + $0x98] sm:$0xff] %v957_v37  ;;  %v1328_v38 = vpop.f32.mrb[56].mxu1 }
 0x3b4   :  { %v1329_v39 = vpop.f32.mrb[57].mxu1 }
 0x3b5   :  { %v1330_v40 = vadd.f32 %v1329_v39, %v1328_v38  ;;  %v1331_v41 = vpop.f32.mrb[58].mxu1 }
 0x3b6   :  { %v1332_v43 = vpop.f32.mrb[59].mxu1 }
 0x3b7   :  { %v962_v44 = vadd.f32 %v1330_v40, %v1853_v18  ;;  %v1333_v47 = vadd.f32 %v1332_v43, %v1331_v41 }
 0x3b9   :  { %1028 = vst [vmem:[#allocation8 + $0xa0] sm:$0xff] %v962_v44  ;;  %v965_v48 = vadd.f32 %v1333_v47, %v1853_v18 }
 0x3bb   :  { %1029 = vst [vmem:[#allocation8 + $0xa8] sm:$0xff] %v965_v48  ;;  %v1334_v51 = vpop.f32.mrb[60].mxu1 }
 0x3bc   :  { %v1335_v52 = vpop.f32.mrb[61].mxu1 }
 0x3bd   :  { %v1336_v53 = vadd.f32 %v1335_v52, %v1334_v51  ;;  %v1337_v54 = vpop.f32.mrb[62].mxu1 }
 0x3be   :  { %v1338_v55 = vpop.f32.mrb[63].mxu1 }
 0x3bf   :  { %v970_v50 = vadd.f32 %v1336_v53, %v1853_v18  ;;  %v1339_v58 = vadd.f32 %v1338_v55, %v1337_v54 }
 0x3c1   :  { %1030 = vst [vmem:[#allocation8 + $0xb0] sm:$0xff] %v970_v50  ;;  %v973_v61 = vadd.f32 %v1339_v58, %v1853_v18 }
 0x3c3   :  { %1031 = vst [vmem:[#allocation8 + $0xb8] sm:$0xff] %v973_v61  ;;  %v1340_v63 = vpop.f32.mrb[64].mxu1 }
 0x3c4   :  { %v1341_v11 = vpop.f32.mrb[65].mxu1 }
 0x3c5   :  { %v1342_v1 = vadd.f32 %v1341_v11, %v1340_v63  ;;  %v1343_v2 = vpop.f32.mrb[66].mxu1 }
 0x3c6   :  { %v1344_v3 = vpop.f32.mrb[67].mxu1 }
 0x3c7   :  { %v978_v4 = vadd.f32 %v1342_v1, %v1853_v18  ;;  %v1345_v5 = vadd.f32 %v1344_v3, %v1343_v2 }
 0x3c9   :  { %1032 = vst [vmem:[#allocation8 + $0xc0] sm:$0xff] %v978_v4  ;;  %v981_v6 = vadd.f32 %v1345_v5, %v1853_v18 }
 0x3cb   :  { %1033 = vst [vmem:[#allocation8 + $0xc8] sm:$0xff] %v981_v6  ;;  %v1346_v7 = vpop.f32.mrb[68].mxu1 }
 0x3cc   :  { %v1347_v8 = vpop.f32.mrb[69].mxu1 }
 0x3cd   :  { %v1348_v9 = vadd.f32 %v1347_v8, %v1346_v7  ;;  %v1349_v10 = vpop.f32.mrb[70].mxu1 }
 0x3ce   :  { %v1350_v12 = vpop.f32.mrb[71].mxu1 }
 0x3cf   :  { %v986_v13 = vadd.f32 %v1348_v9, %v1853_v18  ;;  %v1351_v14 = vadd.f32 %v1350_v12, %v1349_v10 }
 0x3d1   :  { %1034 = vst [vmem:[#allocation8 + $0xd0] sm:$0xff] %v986_v13  ;;  %v989_v15 = vadd.f32 %v1351_v14, %v1853_v18 }
 0x3d3   :  { %1035 = vst [vmem:[#allocation8 + $0xd8] sm:$0xff] %v989_v15  ;;  %v1352_v16 = vpop.f32.mrb[72].mxu1 }
 0x3d4   :  { %v1353_v21 = vpop.f32.mrb[73].mxu1 }
 0x3d5   :  { %v1354_v23 = vadd.f32 %v1353_v21, %v1352_v16  ;;  %v1355_v45 = vpop.f32.mrb[74].mxu1 }
 0x3d6   :  { %v1356_v46 = vpop.f32.mrb[75].mxu1 }
 0x3d7   :  { %v994_v49 = vadd.f32 %v1354_v23, %v1853_v18  ;;  %v1357_v56 = vadd.f32 %v1356_v46, %v1355_v45 }
 0x3d9   :  { %1036 = vst [vmem:[#allocation8 + $0xe0] sm:$0xff] %v994_v49  ;;  %v997_v59 = vadd.f32 %v1357_v56, %v1853_v18 }
 0x3db   :  { %1037 = vst [vmem:[#allocation8 + $0xe8] sm:$0xff] %v997_v59  ;;  %v1358_v22 = vpop.f32.mrb[76].mxu1 }
 0x3dc   :  { %v1359_v42 = vpop.f32.mrb[77].mxu1 }
 0x3dd   :  { %v1360_v57 = vadd.f32 %v1359_v42, %v1358_v22  ;;  %v1361_v60 = vpop.f32.mrb[78].mxu1 }
 0x3de   :  { %v1362_v62 = vpop.f32.mrb[79].mxu1 }
 0x3df   :  { %v1002_v0 = vadd.f32 %v1360_v57, %v1853_v18  ;;  %v1363_v17 = vadd.f32 %v1362_v62, %v1361_v60 }
 0x3e1   :  { %1038 = vst [vmem:[#allocation8 + $0xf0] sm:$0xff] %v1002_v0  ;;  %v1005_v19 = vadd.f32 %v1363_v17, %v1853_v18 }
 0x3e3   :  { %1039 = vst [vmem:[#allocation8 + $0xf8] sm:$0xff] %v1005_v19 }
 0x3e4   :  { %1585 = shalt.err (!%p1582_p0)
}
 0x3e5   :  { %s1586_s12 = scalar_lea.hbm %s1907_s5, 4096 }
 0x3e6   :  { %p1587_p1 = scmp.ne.s32.totalorder %s1907_s5, %s1586_s12  ;;  %p1590_p2 = scmp.lt.u32.totalorder %s1586_s12, %s1907_s5 }
 0x3e8   :  { %p1592_p3 = pnand %p1590_p2, %p1587_p1 }
 0x3ea   :  { %1595 = shalt.err (!%p1592_p3)
}
 0x3eb   :  { %1051 = dma.vmem_to_hbm [thread:$0]  %s1046_s8, 4096, %s1907_s5, [#allocation4], %s1606_s1, %s1606_s1, %s1607_s17  }
 0x3ec   :  { %1600 = dma.done.wait [#allocation4], 4096  }
 0x3ed   :  { %1601 = vsyncadd [#allocation4], 4294963200 }
 0x3ee   :  { %1055 = vsyncpa [#allocation3], 1 }
 0x3ef   :  { %1056 = vsyncpa [#allocation6], 1 }
 0x3f0   :  { %1057 = vsyncpa [#allocation4], 1 }

</bundles_post_ra>
